<compile_context>
chip_gen: v7x
topology: tpu7x:2x2x1
jax: 0.10.0
libtpu: 0.0.40
codegen_flags: <defaults>
</compile_context>

<pallas_src>
import jax
import jax.numpy as jnp
from jax.experimental import pallas as pl
from jax.experimental.pallas import tpu as pltpu


def _round_up(v: int, m: int) -> int:
    return ((v + m - 1) // m) * m


def _mlp_kernel(x_ref, w1_ref, b1_ref, w2_ref, b2_ref, o_ref):
    # linear1: (TB, K)bf16 @ (K, Hp)bf16 -> f32 accumulator on the MXU
    h = jnp.dot(x_ref[...], w1_ref[...], preferred_element_type=jnp.float32)
    h = h + b1_ref[...]            # (1, Hp) broadcast over batch, f32 VPU
    h = jnp.maximum(h, 0.0)        # ReLU in f32
    # linear2: cast only the dot input to bf16, keep f32 accumulation
    out = jnp.dot(h.astype(jnp.bfloat16), w2_ref[...],
                  preferred_element_type=jnp.float32)
    out = out + b2_ref[...]        # (1, Cp) broadcast, f32
    o_ref[...] = out.astype(o_ref.dtype)


def neural_net2_forward(x, w1, b1, w2, b2, *, tile_b: int = 1024):
    """Forward pass of NeuralNet2 as a batch-tiled fused Pallas TPU kernel.

    x : (B, input_size) float32
    w1: (input_size, hidden_size) float32          (x @ W1 layout)
    b1: (hidden_size,) or (1, hidden_size) float32
    w2: (hidden_size, num_classes) float32
    b2: (num_classes,) or (1, num_classes) float32
    returns (B, num_classes) float32 logits.
    """
    B, K = x.shape
    H = w1.shape[1]
    C = w2.shape[1]
    b1 = jnp.reshape(b1, (1, H))
    b2 = jnp.reshape(b2, (1, C))

    # Lane-dense padding of the matmul N dims / output last dim.
    H_pad = _round_up(H, 128)
    C_pad = _round_up(C, 128)

    # Batch tiling: sublane-aligned tile, pad batch to a whole number of tiles.
    B_pad = _round_up(B, 8)
    TB = min(tile_b, B_pad)
    B_pad = _round_up(B_pad, TB)
    grid = (B_pad // TB,)

    # Zero-padded, dtype-converted operands.  Padded hidden columns produce
    # h == 0 after ReLU and the corresponding rows of w2p are zero, padded
    # class columns produce logits == 0 and are sliced off below.
    xp = jnp.zeros((B_pad, K), jnp.bfloat16).at[:B, :].set(x.astype(jnp.bfloat16))
    w1p = jnp.zeros((K, H_pad), jnp.bfloat16).at[:, :H].set(w1.astype(jnp.bfloat16))
    b1p = jnp.zeros((1, H_pad), jnp.float32).at[:, :H].set(b1.astype(jnp.float32))
    w2p = jnp.zeros((H_pad, C_pad), jnp.bfloat16).at[:H, :C].set(w2.astype(jnp.bfloat16))
    b2p = jnp.zeros((1, C_pad), jnp.float32).at[:, :C].set(b2.astype(jnp.float32))

    out_bytes = B_pad * C_pad * 4
    cost = pl.CostEstimate(
        flops=2 * B_pad * (K * H_pad + H_pad * C_pad),
        transcendentals=0,
        bytes_accessed=(xp.size * 2 + w1p.size * 2 + w2p.size * 2
                        + b1p.size * 4 + b2p.size * 4 + out_bytes),
    )

    out_padded = pl.pallas_call(
        _mlp_kernel,
        out_shape=jax.ShapeDtypeStruct((B_pad, C_pad), jnp.float32),
        grid=grid,
        in_specs=[
            pl.BlockSpec((TB, K), lambda i: (i, 0)),        # x tile, streamed
            pl.BlockSpec((K, H_pad), lambda i: (0, 0)),     # W1 resident
            pl.BlockSpec((1, H_pad), lambda i: (0, 0)),     # b1 resident
            pl.BlockSpec((H_pad, C_pad), lambda i: (0, 0)), # W2 resident
            pl.BlockSpec((1, C_pad), lambda i: (0, 0)),     # b2 resident
        ],
        out_specs=pl.BlockSpec((TB, C_pad), lambda i: (i, 0)),
        compiler_params=pltpu.CompilerParams(
            dimension_semantics=("parallel",)),
        cost_estimate=cost,
    )(xp, w1p, b1p, w2p, b2p)

    return out_padded[:B, :C]


def init_params(key, input_size, hidden_size, num_classes):
    """Deterministic init mimicking torch.nn.Linear's U(-1/sqrt(fan_in), ...)."""
    k1, k2, k3, k4 = jax.random.split(key, 4)
    bound1 = 1.0 / (input_size ** 0.5)
    bound2 = 1.0 / (hidden_size ** 0.5)
    # Stored as (in_features, out_features) so the kernel does x @ W.
    w1 = jax.random.uniform(k1, (input_size, hidden_size), jnp.float32,
                            minval=-bound1, maxval=bound1)
    b1 = jax.random.uniform(k2, (1, hidden_size), jnp.float32,
                            minval=-bound1, maxval=bound1)
    w2 = jax.random.uniform(k3, (hidden_size, num_classes), jnp.float32,
                            minval=-bound2, maxval=bound2)
    b2 = jax.random.uniform(k4, (1, num_classes), jnp.float32,
                            minval=-bound2, maxval=bound2)
    return w1, b1, w2, b2


if __name__ == "__main__":
    # Small shapes consistent with the module's forward.
    batch, input_size, hidden_size, num_classes = 8, 16, 32, 8

    key = jax.random.PRNGKey(0)
    k_x, k_p = jax.random.split(key)
    x = jax.random.normal(k_x, (batch, input_size), jnp.float32)
    w1, b1, w2, b2 = init_params(k_p, input_size, hidden_size, num_classes)

    out = neural_net2_forward(x, w1, b1, w2, b2)
    out = jax.block_until_ready(out)
    assert out.shape == (batch, num_classes)

    # Reference matching the kernel's numerics (bf16 dot inputs, f32 accum).
    h_ref = jnp.dot(x.astype(jnp.bfloat16), w1.astype(jnp.bfloat16),
                    preferred_element_type=jnp.float32) + b1
    h_ref = jnp.maximum(h_ref, 0.0)
    ref_bf16 = jnp.dot(h_ref.astype(jnp.bfloat16), w2.astype(jnp.bfloat16),
                       preferred_element_type=jnp.float32) + b2
    assert jnp.allclose(out, ref_bf16, atol=1e-4, rtol=1e-4)

    # Full-precision reference (PyTorch module semantics) with bf16-level tolerance.
    ref_f32 = jnp.maximum(x @ w1 + b1, 0.0) @ w2 + b2
    assert jnp.allclose(out, ref_f32, atol=3e-2, rtol=3e-2)

    print("KERNEL_OK")
</pallas_src>

<mosaic_0001>
module attributes {stable_mosaic.version = 11 : i64} {
  func.func @_mlp_kernel(%arg0: i32, %arg1: memref<8x16xbf16, #tpu.memory_space<vmem>>, %arg2: memref<16x128xbf16, #tpu.memory_space<vmem>>, %arg3: memref<1x128xf32, #tpu.memory_space<vmem>>, %arg4: memref<128x128xbf16, #tpu.memory_space<vmem>>, %arg5: memref<1x128xf32, #tpu.memory_space<vmem>>, %arg6: memref<8x128xf32, #tpu.memory_space<vmem>>) attributes {dimension_semantics = [#tpu.dimension_semantics<parallel>], iteration_bounds = array<i64: 1>, scalar_prefetch = 0 : i64, scratch_operands = 0 : i64, tpu.core_type = #tpu.core_type<tc>, window_params = [{transform_indices = @transform_0, window_bounds = array<i64: 8, 16>}, {pipeline_mode = #tpu.pipeline_mode<synchronous>, transform_indices = @transform_1, window_bounds = array<i64: 16, 128>}, {pipeline_mode = #tpu.pipeline_mode<synchronous>, transform_indices = @transform_2, window_bounds = array<i64: 1, 128>}, {pipeline_mode = #tpu.pipeline_mode<synchronous>, transform_indices = @transform_3, window_bounds = array<i64: 128, 128>}, {pipeline_mode = #tpu.pipeline_mode<synchronous>, transform_indices = @transform_4, window_bounds = array<i64: 1, 128>}, {transform_indices = @transform_5, window_bounds = array<i64: 8, 128>}]} {
    %c0 = arith.constant 0 : index
    %c0_0 = arith.constant 0 : index
    %0 = vector.load %arg1[%c0, %c0_0] : memref<8x16xbf16, #tpu.memory_space<vmem>>, vector<8x16xbf16>
    %c0_1 = arith.constant 0 : index
    %c0_2 = arith.constant 0 : index
    %1 = vector.load %arg2[%c0_1, %c0_2] : memref<16x128xbf16, #tpu.memory_space<vmem>>, vector<16x128xbf16>
    %cst = arith.constant dense<0.000000e+00> : vector<8x128xf32>
    %2 = tpu.matmul %0, %1, %cst {dimension_numbers = #tpu.dot_dimension_numbers<[1], [0], [0], [1], [0, 0, 1, 1], [], []>} : vector<8x16xbf16>, vector<16x128xbf16>, vector<8x128xf32> -> vector<8x128xf32>
    %c0_3 = arith.constant 0 : index
    %c0_4 = arith.constant 0 : index
    %3 = vector.load %arg3[%c0_3, %c0_4] : memref<1x128xf32, #tpu.memory_space<vmem>>, vector<1x128xf32>
    %4 = vector.broadcast %3 : vector<1x128xf32> to vector<8x128xf32>
    %5 = arith.addf %2, %4 : vector<8x128xf32>
    %cst_5 = arith.constant 0.000000e+00 : f32
    %6 = vector.broadcast %cst_5 : f32 to vector<8x128xf32>
    %7 = arith.maximumf %5, %6 : vector<8x128xf32>
    %8 = arith.truncf %7 : vector<8x128xf32> to vector<8x128xbf16>
    %c0_6 = arith.constant 0 : index
    %c0_7 = arith.constant 0 : index
    %9 = vector.load %arg4[%c0_6, %c0_7] : memref<128x128xbf16, #tpu.memory_space<vmem>>, vector<128x128xbf16>
    %cst_8 = arith.constant dense<0.000000e+00> : vector<8x128xf32>
    %10 = tpu.matmul %8, %9, %cst_8 {dimension_numbers = #tpu.dot_dimension_numbers<[1], [0], [0], [1], [0, 0, 1, 1], [], []>} : vector<8x128xbf16>, vector<128x128xbf16>, vector<8x128xf32> -> vector<8x128xf32>
    %c0_9 = arith.constant 0 : index
    %c0_10 = arith.constant 0 : index
    %11 = vector.load %arg5[%c0_9, %c0_10] : memref<1x128xf32, #tpu.memory_space<vmem>>, vector<1x128xf32>
    %12 = vector.broadcast %11 : vector<1x128xf32> to vector<8x128xf32>
    %13 = arith.addf %10, %12 : vector<8x128xf32>
    %c0_11 = arith.constant 0 : index
    %c0_12 = arith.constant 0 : index
    %14 = vector.load %arg6[%c0_11, %c0_12] : memref<8x128xf32, #tpu.memory_space<vmem>>, vector<8x128xf32>
    tpu.vector_store %arg6[%c0_11, %c0_12], %13 {strides = array<i32>} : memref<8x128xf32, #tpu.memory_space<vmem>>, vector<8x128xf32>,
    return
  }
  func.func @transform_0(%arg0: i32) -> (i32, i32) {
    %c0_i32 = arith.constant 0 : i32
    %c0_i32_0 = arith.constant 0 : i32
    return %arg0, %c0_i32 : i32, i32
  }
  func.func @transform_1(%arg0: i32) -> (i32, i32) {
    %c0_i32 = arith.constant 0 : i32
    %c0_i32_0 = arith.constant 0 : i32
    %c0_i32_1 = arith.constant 0 : i32
    return %c0_i32, %c0_i32_0 : i32, i32
  }
  func.func @transform_2(%arg0: i32) -> (i32, i32) {
    %c0_i32 = arith.constant 0 : i32
    %c0_i32_0 = arith.constant 0 : i32
    %c0_i32_1 = arith.constant 0 : i32
    return %c0_i32, %c0_i32_0 : i32, i32
  }
  func.func @transform_3(%arg0: i32) -> (i32, i32) {
    %c0_i32 = arith.constant 0 : i32
    %c0_i32_0 = arith.constant 0 : i32
    %c0_i32_1 = arith.constant 0 : i32
    return %c0_i32, %c0_i32_0 : i32, i32
  }
  func.func @transform_4(%arg0: i32) -> (i32, i32) {
    %c0_i32 = arith.constant 0 : i32
    %c0_i32_0 = arith.constant 0 : i32
    %c0_i32_1 = arith.constant 0 : i32
    return %c0_i32, %c0_i32_0 : i32, i32
  }
  func.func @transform_5(%arg0: i32) -> (i32, i32) {
    %c0_i32 = arith.constant 0 : i32
    %c0_i32_0 = arith.constant 0 : i32
    return %arg0, %c0_i32 : i32, i32
  }
}

</mosaic_0001>

<bundles_post_ra>
// kernel: tpu_custom_call.1
= control target key start
LH: loop header
LB: loop body
LE: loop exit
PB: predicated region body
PF: predicated region fallthrough
CT: control target
= control target key end

     0   :  { %10 = vsyncpa [#allocation3], 0  ;;  %s509_s0 = inlined_call_operand.hbm [shape: bf16[8,16], index: 0, kind: input, shape index: {}]   ;;  %s510_s1 = inlined_call_operand.hbm [shape: bf16[16,128], index: 1, kind: input, shape index: {}]   ;;  %s511_s2 = inlined_call_operand.vmem [shape: f32[1,128], index: 2, kind: input, shape index: {}]   ;;  %s512_s3 = inlined_call_operand.hbm [shape: bf16[128,128], index: 3, kind: input, shape index: {}]   ;;  %s513_s4 = inlined_call_operand.vmem [shape: f32[1,128], index: 4, kind: input, shape index: {}]   ;;  %s514_s5 = inlined_call_operand.hbm [shape: f32[8,128], index: 5, kind: output, shape index: {}]  }
   0x1   :  { %11 = vsyncpa [#allocation6], 0 }
   0x2   :  { %12 = vsyncpa [#allocation4], 0  ;;  %s411_s18 = smov [#allocation5]   ;;  %s317_s22 = scalar_lea.hbm %s510_s1, 128 }
   0x3   :  { %s28_s19 = sshll.u32 %s411_s18, 4  ;;  %p318_p0 = scmp.ne.s32.totalorder %s510_s1, %s317_s22  ;;  %s29_s19 = int_to_ptr.vmem [resolvable:$true] %s28_s19 }
   0x4   :  { %p321_p1 = scmp.lt.u32.totalorder %s317_s22, %s510_s1 }
   0x6   :  { %p323_p2 = pnand %p321_p1, %p318_p0 }
   0x8   :  { %326 = shalt.err (!%p323_p2)
}
   0x9   :  { %s327_s27 = scalar_lea.vmem %s29_s19, 128  ;;  %p332_p4 = scmp.lt.s32.totalorder %s29_s19, %s29_s19 }
   0xa   :  { %p328_p3 = scmp.ne.s32.totalorder %s29_s19, %s327_s27  ;;  %p333_p5 = scmp.lt.s32.totalorder %s327_s27, %s327_s27 }
   0xc   :  { %p334_p6 = por %p333_p5, %p332_p4 }
   0xe   :  { %p335_p7 = pnand %p334_p6, %p328_p3 }
  0x10   :  { %338 = shalt.err (!%p335_p7)
}
  0x11   :  { %s412_s28 = smov 64   ;;  %s413_s29 = smov 4  }
  0x12   :  { %34 = dma.hbm_to_vmem [thread:$0]  %s510_s1, 128, %s29_s19, [#allocation6], %s412_s28, %s412_s28, %s413_s29  }
  0x13   :  { %s414_s7 = smov [#allocation2]   ;;  %s415_s9 = smov [#allocation7]  }
  0x14   :  { %s19_s8 = sshll.u32 %s414_s7, 4  ;;  %s42_s10 = sshll.u32 %s415_s9, 4  ;;  %s20_s8 = int_to_ptr.vmem [resolvable:$true] %s19_s8  ;;  %s43_s10 = int_to_ptr.vmem [resolvable:$true] %s42_s10 }
  0x15   :  { %s339_s13 = scalar_lea.hbm %s509_s0, 64 }
  0x16   :  { %p340_p8 = scmp.ne.s32.totalorder %s509_s0, %s339_s13  ;;  %p343_p9 = scmp.lt.u32.totalorder %s339_s13, %s509_s0 }
  0x18   :  { %p345_p10 = pnand %p343_p9, %p340_p8 }
  0x1a   :  { %348 = shalt.err (!%p345_p10)
}
  0x1b   :  { %s349_s1 = scalar_lea.vmem %s20_s8, 64  ;;  %p354_p12 = scmp.lt.s32.totalorder %s20_s8, %s20_s8 }
  0x1c   :  { %p350_p11 = scmp.ne.s32.totalorder %s20_s8, %s349_s1  ;;  %p355_p13 = scmp.lt.s32.totalorder %s349_s1, %s349_s1 }
  0x1e   :  { %p356_p0 = por %p355_p13, %p354_p12 }
  0x20   :  { %p357_p1 = pnand %p356_p0, %p350_p11 }
  0x22   :  { %360 = shalt.err (!%p357_p1)
}
  0x23   :  { %22 = dma.hbm_to_vmem [thread:$0]  %s509_s0, 64, %s20_s8, [#allocation3]  }
  0x24   :  { %s361_s22 = scalar_lea.hbm %s512_s3, 1024 }
  0x25   :  { %p362_p2 = scmp.ne.s32.totalorder %s512_s3, %s361_s22  ;;  %p365_p3 = scmp.lt.u32.totalorder %s361_s22, %s512_s3 }
  0x27   :  { %p367_p4 = pnand %p365_p3, %p362_p2 }
  0x29   :  { %370 = shalt.err (!%p367_p4)
}
  0x2a   :  { %s371_s27 = scalar_lea.vmem %s43_s10, 1024  ;;  %p376_p6 = scmp.lt.s32.totalorder %s43_s10, %s43_s10 }
  0x2b   :  { %p372_p5 = scmp.ne.s32.totalorder %s43_s10, %s371_s27  ;;  %p377_p7 = scmp.lt.s32.totalorder %s371_s27, %s371_s27 }
  0x2d   :  { %p378_p8 = por %p377_p7, %p376_p6 }
  0x2f   :  { %p379_p9 = pnand %p378_p8, %p372_p5 }
  0x31   :  { %382 = shalt.err (!%p379_p9)
}
  0x32   :  { %48 = dma.hbm_to_vmem [thread:$0]  %s512_s3, 1024, %s43_s10, [#allocation6], %s412_s28, %s412_s28, %s413_s29  }
  0x33   :  { %405 = dma.done.wait [#allocation3], 64  }
  0x34   :  { %406 = vsyncadd [#allocation3], 4294967232 }
  0x35   :  { %407 = dma.done.wait [#allocation6], 1152  }
  0x36   :  { %408 = vsyncadd [#allocation6], 4294966144  ;;  %v416_v0 = vmov 0.0   ;;  %vm417_vm0 = vmmov 0   ;;  %v308_v1 = vld [vmem:[#allocation5] sm:$0xff]   ;;  %vm77_vm1 = vcmask 130048  }
  0x37   :  { %274 = vmatprep.subr.bf16.mxu0 %v416_v0  ;;  %276 = vmatprep.mubr.msk.bf16.mxu0 %vm417_vm0, %v416_v0  ;;  %v61_v2 = vld [vmem:[#allocation2] sm:$0xf]  ;;  %v309_v3 = vld [vmem:[#allocation7] sm:$0xff]   ;;  %v310_v4 = vld [vmem:[#allocation7 + $0x8] sm:$0xff]   ;;  %s418_s7 = smov [#allocation8]  }
  0x38   :  { %280 = vmatprep.subr.bf16.mxu1 %v416_v0  ;;  %296 = vmatprep.mubr.msk.bf16.mxu1 %vm417_vm0, %v416_v0  ;;  %v311_v5 = vld [vmem:[#allocation7 + $0x10] sm:$0xff]   ;;  %v312_v6 = vld [vmem:[#allocation7 + $0x18] sm:$0xff]   ;;  %v313_v7 = vld [vmem:[#allocation7 + $0x20] sm:$0xff]   ;;  %s241_s8 = sshll.u32 %s418_s7, 4  ;;  %s242_s8 = int_to_ptr.vmem [resolvable:$true] %s241_s8 }
  0x39   :  { %275 = vmatpush3.bf16.msra.mxu0 %v308_v1  ;;  %281 = vmatpush3.bf16.msra.mxu1 %v309_v3  ;;  %v314_v8 = vld [vmem:[#allocation7 + $0x28] sm:$0xff]   ;;  %v315_v9 = vld [vmem:[#allocation7 + $0x30] sm:$0xff]   ;;  %v316_v10 = vld [vmem:[#allocation7 + $0x38] sm:$0xff]   ;;  %p388_p11 = scmp.lt.s32.totalorder %s242_s8, %s242_s8 }
  0x3a   :  { %282 = vmatprep.subr.bf16.mxu1 %v416_v0  ;;  %v251_v11 = vld [vmem:[%s511_s2] ss:$0 sm:$0xff]  ;;  %s383_s2 = scalar_lea.vmem %s242_s8, 128 }
  0x3b   :  { %v254_v19 = vld [vmem:[%s513_s4] ss:$0 sm:$0xff]  ;;  %p384_p10 = scmp.ne.s32.totalorder %s242_s8, %s383_s2  ;;  %p389_p12 = scmp.lt.s32.totalorder %s383_s2, %s383_s2 }
  0x3c   :  { %277 = vmatmul.mubr.msk.bf16.vlgmr.msra.gmra.mrb[0].mxu0 %vm77_vm1, %v61_v2 }
  0x3d   :  { %283 = vmatpush3.bf16.msra.mxu1 %v310_v4  ;;  %p390_p13 = por %p389_p12, %p388_p11 }
  0x3e   :  { %284 = vmatprep.subr.bf16.mxu1 %v416_v0 }
  0x3f   :  { %p391_p0 = pnand %p390_p13, %p384_p10 }
  0x41   :  { %285 = vmatpush3.bf16.msra.mxu1 %v311_v5 }
  0x42   :  { %286 = vmatprep.subr.bf16.mxu1 %v416_v0 }
  0x45   :  { %287 = vmatpush3.bf16.msra.mxu1 %v312_v6 }
  0x46   :  { %288 = vmatprep.subr.bf16.mxu1 %v416_v0 }
  0x49   :  { %289 = vmatpush3.bf16.msra.mxu1 %v313_v7 }
  0x4a   :  { %290 = vmatprep.subr.bf16.mxu1 %v416_v0 }
  0x4d   :  { %291 = vmatpush3.bf16.msra.mxu1 %v314_v8 }
  0x4e   :  { %292 = vmatprep.subr.bf16.mxu1 %v416_v0 }
  0x51   :  { %293 = vmatpush3.bf16.msra.mxu1 %v315_v9 }
  0x52   :  { %294 = vmatprep.subr.bf16.mxu1 %v416_v0 }
  0x55   :  { %295 = vmatpush3.bf16.msra.mxu1 %v316_v10 }
 0x10f   :  { %v115_v12 = vpop.f32.mrb[0].mxu0 }
 0x110   :  { %v116_v13 = vadd.f32 %v251_v11, %v115_v12  ;;  %v278_v14 = vpop.f32.mrb[1].mxu0 }
 0x111   :  { %v118_v15 = vpop.f32.mrb[2].mxu0 }
 0x112   :  { %v121_v16 = vmax.f32 %v116_v13, 0.0  ;;  %v279_v17 = vpop.f32.mrb[3].mxu0 }
 0x114   :  { %v122_v18 = vpack.c.bf16 %v121_v16, %v121_v16 }
 0x116   :  { %297 = vmatmul.mubr.bf16.vlgmr.msra.gmra.mrb[0].mxu1 %v122_v18 }
 0x1e9   :  { %v228_v20 = vpop.f32.mrb[0].mxu1 }
 0x1ea   :  { %v229_v21 = vadd.f32 %v254_v19, %v228_v20  ;;  %v298_v22 = vpop.f32.mrb[1].mxu1 }
 0x1eb   :  { %v231_v23 = vpop.f32.mrb[2].mxu1 }
 0x1ec   :  { %234 = vst [vmem:[#allocation8] sm:$0xff] %v229_v21  ;;  %v299_v24 = vpop.f32.mrb[3].mxu1 }
 0x1ed   :  { %394 = shalt.err (!%p391_p0)
}
 0x1ee   :  { %s395_s4 = scalar_lea.hbm %s514_s5, 128 }
 0x1ef   :  { %p396_p1 = scmp.ne.s32.totalorder %s514_s5, %s395_s4  ;;  %p399_p2 = scmp.lt.u32.totalorder %s395_s4, %s514_s5 }
 0x1f1   :  { %p401_p3 = pnand %p399_p2, %p396_p1 }
 0x1f3   :  { %404 = shalt.err (!%p401_p3)
}
 0x1f4   :  { %244 = dma.vmem_to_hbm [thread:$0]  %s242_s8, 128, %s514_s5, [#allocation4]  }
 0x1f5   :  { %409 = dma.done.wait [#allocation4], 128  }
 0x1f6   :  { %410 = vsyncadd [#allocation4], 4294967168 }
 0x1f7   :  { %248 = vsyncpa [#allocation3], 1 }
 0x1f8   :  { %249 = vsyncpa [#allocation6], 1 }
 0x1f9   :  { %250 = vsyncpa [#allocation4], 1 }

</bundles_post_ra>
